<compile_context>
chip_gen: v5e
topology: v5e:2x2
jax: 0.10.0
libtpu: 0.0.40
codegen_flags: <defaults>
</compile_context>

<pallas_src>
import jax
import jax.numpy as jnp
from jax import lax
from jax.experimental import pallas as pl
from jax.experimental.pallas import tpu as pltpu


def _make_bert_embeddings_kernel(eps, tile_tokens, depth):
    def kernel(wid_ref, tid_ref, pid_ref, gid_ref,            # scalar prefetch (SMEM)
               word_hbm, type_tab_ref, pos_tab_ref, tag_tab_ref,
               gamma_ref, beta_ref,
               out_ref,
               word_blk, copy_sem):
        base = pl.program_id(0) * tile_tokens

        def start_fetch(t, slot):
            row = wid_ref[base + t]
            pltpu.make_async_copy(word_hbm.at[pl.ds(row, 1)],
                                  word_blk.at[pl.ds(t, 1)],
                                  copy_sem.at[slot]).start()

        def wait_fetch(slot):
            # Only the byte count (one row) and the semaphore slot matter here.
            pltpu.make_async_copy(word_hbm.at[pl.ds(0, 1)],
                                  word_blk.at[pl.ds(0, 1)],
                                  copy_sem.at[slot]).wait()

        # Prime `depth` in-flight word-row gathers (static unroll, tiny).
        for t in range(depth):
            start_fetch(t, t)

        # Per-token loop: retire DMA slot (t % depth), immediately re-arm it
        # with row t+depth, then add the three VMEM-resident small tables into
        # the output row.  This VPU work hides the word-row DMA latency.
        @pl.loop(0, tile_tokens)
        def _(t):
            slot = t % depth
            wait_fetch(slot)

            @pl.when(t + depth < tile_tokens)
            def _():
                start_fetch(t + depth, slot)

            g = base + t
            row = type_tab_ref[pl.ds(tid_ref[g], 1), :].astype(jnp.float32)
            row = row + pos_tab_ref[pl.ds(pid_ref[g], 1), :].astype(jnp.float32)
            row = row + tag_tab_ref[pl.ds(gid_ref[g], 1), :].astype(jnp.float32)
            out_ref[pl.ds(t, 1), :] = row

        # Every word-row copy was waited inside the loop: the whole (TN, H)
        # slab is valid.  Do the word add + LayerNorm fully vectorized.
        emb = out_ref[...] + word_blk[...].astype(jnp.float32)
        mean = jnp.mean(emb, axis=-1, keepdims=True)
        centered = emb - mean
        var = jnp.mean(centered * centered, axis=-1, keepdims=True)
        normed = centered * lax.rsqrt(var + eps)
        out_ref[...] = normed * gamma_ref[...] + beta_ref[...]
        # Dropout: identity in eval mode.
        # TODO(synk): training-mode dropout (hidden_dropout_prob) not implemented.

    return kernel


def bert_embeddings(input_ids, token_type_ids, position_ids, pos_tag_ids,
                    word_tab, type_tab, pos_tab, tag_tab, gamma, beta,
                    eps=1e-12, token_tile=512, past_key_values_length=0):
    B, S = input_ids.shape
    H = word_tab.shape[1]
    N = B * S

    # Module-default ids (matches the PyTorch forward when these are None).
    if position_ids is None:
        position_ids = jnp.broadcast_to(
            jnp.arange(past_key_values_length,
                       past_key_values_length + S, dtype=jnp.int32)[None, :],
            (B, S))
    if token_type_ids is None:
        token_type_ids = jnp.zeros((B, S), jnp.int32)

    def _round_up(a, b):
        return (a + b - 1) // b * b

    # Token tile: multiple of 8 sublanes, at most ~token_tile rows.
    tn = min(_round_up(token_tile, 8), _round_up(N, 8))
    n_pad = _round_up(N, tn)
    depth = min(16, tn)                       # in-flight word-row DMAs per core

    def _flat_pad(x):
        x = x.reshape(N).astype(jnp.int32)
        if n_pad > N:
            x = jnp.concatenate([x, jnp.zeros((n_pad - N,), jnp.int32)])
        return x

    wid, tid, pid, gid = (_flat_pad(x) for x in
                          (input_ids, token_type_ids, position_ids, pos_tag_ids))

    gamma2 = gamma.reshape(1, H).astype(jnp.float32)
    beta2 = beta.reshape(1, H).astype(jnp.float32)
    # NOTE: for real BERT sizes, cast the embedding tables to bf16 before this
    # call to halve HBM gather traffic; rows are upcast to f32 inside the kernel.

    kernel = _make_bert_embeddings_kernel(float(eps), tn, depth)

    grid_spec = pltpu.PrefetchScalarGridSpec(
        num_scalar_prefetch=4,                       # wid, tid, pid, gid -> SMEM
        grid=(n_pad // tn,),
        in_specs=[
            pl.BlockSpec(memory_space=pl.ANY),                        # word_tab stays in HBM
            pl.BlockSpec(type_tab.shape, lambda i, *_: (0, 0)),       # VMEM-resident
            pl.BlockSpec(pos_tab.shape, lambda i, *_: (0, 0)),        # VMEM-resident
            pl.BlockSpec(tag_tab.shape, lambda i, *_: (0, 0)),        # VMEM-resident
            pl.BlockSpec((1, H), lambda i, *_: (0, 0)),               # gamma
            pl.BlockSpec((1, H), lambda i, *_: (0, 0)),               # beta
        ],
        out_specs=pl.BlockSpec((tn, H), lambda i, *_: (i, 0)),
        scratch_shapes=[
            pltpu.VMEM((tn, H), word_tab.dtype),      # gathered word rows (slab)
            pltpu.SemaphoreType.DMA((depth,)),        # one sem per in-flight copy
        ],
    )

    # Explicit VMEM budget: resident small tables + word slab + double-buffered
    # output tile + slack.
    itemsize = jnp.dtype(word_tab.dtype).itemsize
    resident = (type_tab.size + pos_tab.size + tag_tab.size) * itemsize + 2 * H * 4
    word_blk_bytes = tn * H * itemsize
    out_tiles = 2 * tn * H * 4
    budget = resident + word_blk_bytes + out_tiles + (4 << 20)
    vmem_limit = int(min(max(budget, 16 << 20), 64 << 20))

    out = pl.pallas_call(
        kernel,
        out_shape=jax.ShapeDtypeStruct((n_pad, H), jnp.float32),
        grid_spec=grid_spec,
        compiler_params=pltpu.CompilerParams(
            dimension_semantics=("parallel",),
            vmem_limit_bytes=vmem_limit),
    )(wid, tid, pid, gid,
      word_tab, type_tab, pos_tab, tag_tab, gamma2, beta2)

    return out[:N].reshape(B, S, H)


def _reference(input_ids, token_type_ids, position_ids, pos_tag_ids,
               word_tab, type_tab, pos_tab, tag_tab, gamma, beta, eps=1e-12):
    emb = (jnp.take(word_tab, input_ids, axis=0)
           + jnp.take(type_tab, token_type_ids, axis=0)
           + jnp.take(pos_tab, position_ids, axis=0)
           + jnp.take(tag_tab, pos_tag_ids, axis=0))
    mean = jnp.mean(emb, axis=-1, keepdims=True)
    var = jnp.mean((emb - mean) ** 2, axis=-1, keepdims=True)
    return (emb - mean) * jax.lax.rsqrt(var + eps) * gamma + beta


if __name__ == "__main__":
    # small config consistent with BertEmbeddings
    B, S, H = 2, 8, 32
    VOCAB, MAX_POS, TYPE_VOCAB, N_TAGS = 128, 64, 2, 48
    PAD_ID = 0
    EPS = 1e-12

    key = jax.random.PRNGKey(0)
    k_w, k_p, k_t, k_g, k_ids, k_tt, k_tag = jax.random.split(key, 7)

    # deterministic parameter init (synthetic)
    word_tab = jax.random.normal(k_w, (VOCAB, H), jnp.float32) * 0.02
    word_tab = word_tab.at[PAD_ID].set(0.0)          # padding_idx row zeroed
    pos_tab = jax.random.normal(k_p, (MAX_POS, H), jnp.float32) * 0.02
    type_tab = jax.random.normal(k_t, (TYPE_VOCAB, H), jnp.float32) * 0.02
    tag_tab = jax.random.normal(k_g, (N_TAGS, H), jnp.float32) * 0.02
    gamma = jnp.ones((H,), jnp.float32)
    beta = jnp.zeros((H,), jnp.float32)

    # inputs
    input_ids = jax.random.randint(k_ids, (B, S), 0, VOCAB, jnp.int32)
    token_type_ids = jax.random.randint(k_tt, (B, S), 0, TYPE_VOCAB, jnp.int32)
    pos_tag_ids = jax.random.randint(k_tag, (B, S), 0, N_TAGS, jnp.int32)
    # default position ids: arange(seq_len) broadcast over batch (past_kv_len = 0)
    position_ids = jnp.broadcast_to(jnp.arange(S, dtype=jnp.int32)[None, :], (B, S))

    # token_tile=8 -> two grid steps, exercises the tiled "parallel" pipeline
    out = bert_embeddings(input_ids, token_type_ids, position_ids, pos_tag_ids,
                          word_tab, type_tab, pos_tab, tag_tab, gamma, beta,
                          eps=EPS, token_tile=8)
    out = jax.block_until_ready(out)

    ref = _reference(input_ids, token_type_ids, position_ids, pos_tag_ids,
                     word_tab, type_tab, pos_tab, tag_tab, gamma, beta, EPS)
    assert out.shape == (B, S, H)
    assert jnp.allclose(out, ref, atol=1e-4, rtol=1e-4)

    print("KERNEL_OK")
</pallas_src>

<mosaic_0001>
module attributes {stable_mosaic.version = 11 : i64} {
  func.func @kernel(%arg0: i32, %arg1: memref<16xi32, #tpu.memory_space<smem>>, %arg2: memref<16xi32, #tpu.memory_space<smem>>, %arg3: memref<16xi32, #tpu.memory_space<smem>>, %arg4: memref<16xi32, #tpu.memory_space<smem>>, %arg5: memref<128x32xf32, #tpu.memory_space<any>>, %arg6: memref<2x32xf32, #tpu.memory_space<vmem>>, %arg7: memref<64x32xf32, #tpu.memory_space<vmem>>, %arg8: memref<48x32xf32, #tpu.memory_space<vmem>>, %arg9: memref<1x32xf32, #tpu.memory_space<vmem>>, %arg10: memref<1x32xf32, #tpu.memory_space<vmem>>, %arg11: memref<8x32xf32, #tpu.memory_space<vmem>>, %arg12: memref<8x32xf32, #tpu.memory_space<vmem>>, %arg13: memref<8x!tpu.dma_semaphore, #tpu.memory_space<semaphore_mem>>) attributes {dimension_semantics = [#tpu.dimension_semantics<parallel>], iteration_bounds = array<i64: 2>, scalar_prefetch = 4 : i64, scratch_operands = 2 : i64, tpu.core_type = #tpu.core_type<tc>, window_params = [{}, {pipeline_mode = #tpu.pipeline_mode<synchronous>, transform_indices = @transform_1, window_bounds = array<i64: 2, 32>}, {pipeline_mode = #tpu.pipeline_mode<synchronous>, transform_indices = @transform_2, window_bounds = array<i64: 64, 32>}, {pipeline_mode = #tpu.pipeline_mode<synchronous>, transform_indices = @transform_3, window_bounds = array<i64: 48, 32>}, {pipeline_mode = #tpu.pipeline_mode<synchronous>, transform_indices = @transform_4, window_bounds = array<i64: 1, 32>}, {pipeline_mode = #tpu.pipeline_mode<synchronous>, transform_indices = @transform_5, window_bounds = array<i64: 1, 32>}, {transform_indices = @transform_6, window_bounds = array<i64: 8, 32>}]} {
    %c8_i32 = arith.constant 8 : i32
    %0 = arith.muli %arg0, %c8_i32 : i32
    %c0_i32 = arith.constant 0 : i32
    %1 = arith.addi %0, %c0_i32 : i32
    %2 = arith.index_cast %1 : i32 to index
    %3 = memref.load %arg1[%2] : memref<16xi32, #tpu.memory_space<smem>>
    %c0_i32_0 = arith.constant 0 : i32
    %c0_i32_1 = arith.constant 0 : i32
    %4 = tpu.memref_slice %arg5[%3, %c0_i32_1] : memref<128x32xf32, #tpu.memory_space<any>> -> memref<1x32xf32, #tpu.memory_space<any>>
    %c0_i32_2 = arith.constant 0 : i32
    %c0_i32_3 = arith.constant 0 : i32
    %5 = tpu.memref_slice %arg12[%c0_i32_2, %c0_i32_3] : memref<8x32xf32, #tpu.memory_space<vmem>> -> memref<1x32xf32, #tpu.memory_space<vmem>>
    %6 = tpu.memref_slice %arg13[%c0_i32_0] : memref<8x!tpu.dma_semaphore, #tpu.memory_space<semaphore_mem>> -> memref<1x!tpu.dma_semaphore, #tpu.memory_space<semaphore_mem>>
    %7 = tpu.memref_squeeze %6 : memref<1x!tpu.dma_semaphore, #tpu.memory_space<semaphore_mem>> -> memref<!tpu.dma_semaphore, #tpu.memory_space<semaphore_mem>>
    tpu.enqueue_dma source(%4 : memref<1x32xf32, #tpu.memory_space<any>>) target(%5 : memref<1x32xf32, #tpu.memory_space<vmem>>) target_semaphore(%7 : memref<!tpu.dma_semaphore, #tpu.memory_space<semaphore_mem>>)
    %c1_i32 = arith.constant 1 : i32
    %8 = arith.addi %0, %c1_i32 : i32
    %9 = arith.index_cast %8 : i32 to index
    %10 = memref.load %arg1[%9] : memref<16xi32, #tpu.memory_space<smem>>
    %c1_i32_4 = arith.constant 1 : i32
    %c0_i32_5 = arith.constant 0 : i32
    %11 = tpu.memref_slice %arg5[%10, %c0_i32_5] : memref<128x32xf32, #tpu.memory_space<any>> -> memref<1x32xf32, #tpu.memory_space<any>>
    %c1_i32_6 = arith.constant 1 : i32
    %c0_i32_7 = arith.constant 0 : i32
    %12 = tpu.memref_slice %arg12[%c1_i32_6, %c0_i32_7] : memref<8x32xf32, #tpu.memory_space<vmem>> -> memref<1x32xf32, #tpu.memory_space<vmem>>
    %13 = tpu.memref_slice %arg13[%c1_i32_4] : memref<8x!tpu.dma_semaphore, #tpu.memory_space<semaphore_mem>> -> memref<1x!tpu.dma_semaphore, #tpu.memory_space<semaphore_mem>>
    %14 = tpu.memref_squeeze %13 : memref<1x!tpu.dma_semaphore, #tpu.memory_space<semaphore_mem>> -> memref<!tpu.dma_semaphore, #tpu.memory_space<semaphore_mem>>
    tpu.enqueue_dma source(%11 : memref<1x32xf32, #tpu.memory_space<any>>) target(%12 : memref<1x32xf32, #tpu.memory_space<vmem>>) target_semaphore(%14 : memref<!tpu.dma_semaphore, #tpu.memory_space<semaphore_mem>>)
    %c2_i32 = arith.constant 2 : i32
    %15 = arith.addi %0, %c2_i32 : i32
    %16 = arith.index_cast %15 : i32 to index
    %17 = memref.load %arg1[%16] : memref<16xi32, #tpu.memory_space<smem>>
    %c2_i32_8 = arith.constant 2 : i32
    %c0_i32_9 = arith.constant 0 : i32
    %18 = tpu.memref_slice %arg5[%17, %c0_i32_9] : memref<128x32xf32, #tpu.memory_space<any>> -> memref<1x32xf32, #tpu.memory_space<any>>
    %c2_i32_10 = arith.constant 2 : i32
    %c0_i32_11 = arith.constant 0 : i32
    %19 = tpu.memref_slice %arg12[%c2_i32_10, %c0_i32_11] : memref<8x32xf32, #tpu.memory_space<vmem>> -> memref<1x32xf32, #tpu.memory_space<vmem>>
    %20 = tpu.memref_slice %arg13[%c2_i32_8] : memref<8x!tpu.dma_semaphore, #tpu.memory_space<semaphore_mem>> -> memref<1x!tpu.dma_semaphore, #tpu.memory_space<semaphore_mem>>
    %21 = tpu.memref_squeeze %20 : memref<1x!tpu.dma_semaphore, #tpu.memory_space<semaphore_mem>> -> memref<!tpu.dma_semaphore, #tpu.memory_space<semaphore_mem>>
    tpu.enqueue_dma source(%18 : memref<1x32xf32, #tpu.memory_space<any>>) target(%19 : memref<1x32xf32, #tpu.memory_space<vmem>>) target_semaphore(%21 : memref<!tpu.dma_semaphore, #tpu.memory_space<semaphore_mem>>)
    %c3_i32 = arith.constant 3 : i32
    %22 = arith.addi %0, %c3_i32 : i32
    %23 = arith.index_cast %22 : i32 to index
    %24 = memref.load %arg1[%23] : memref<16xi32, #tpu.memory_space<smem>>
    %c3_i32_12 = arith.constant 3 : i32
    %c0_i32_13 = arith.constant 0 : i32
    %25 = tpu.memref_slice %arg5[%24, %c0_i32_13] : memref<128x32xf32, #tpu.memory_space<any>> -> memref<1x32xf32, #tpu.memory_space<any>>
    %c3_i32_14 = arith.constant 3 : i32
    %c0_i32_15 = arith.constant 0 : i32
    %26 = tpu.memref_slice %arg12[%c3_i32_14, %c0_i32_15] : memref<8x32xf32, #tpu.memory_space<vmem>> -> memref<1x32xf32, #tpu.memory_space<vmem>>
    %27 = tpu.memref_slice %arg13[%c3_i32_12] : memref<8x!tpu.dma_semaphore, #tpu.memory_space<semaphore_mem>> -> memref<1x!tpu.dma_semaphore, #tpu.memory_space<semaphore_mem>>
    %28 = tpu.memref_squeeze %27 : memref<1x!tpu.dma_semaphore, #tpu.memory_space<semaphore_mem>> -> memref<!tpu.dma_semaphore, #tpu.memory_space<semaphore_mem>>
    tpu.enqueue_dma source(%25 : memref<1x32xf32, #tpu.memory_space<any>>) target(%26 : memref<1x32xf32, #tpu.memory_space<vmem>>) target_semaphore(%28 : memref<!tpu.dma_semaphore, #tpu.memory_space<semaphore_mem>>)
    %c4_i32 = arith.constant 4 : i32
    %29 = arith.addi %0, %c4_i32 : i32
    %30 = arith.index_cast %29 : i32 to index
    %31 = memref.load %arg1[%30] : memref<16xi32, #tpu.memory_space<smem>>
    %c4_i32_16 = arith.constant 4 : i32
    %c0_i32_17 = arith.constant 0 : i32
    %32 = tpu.memref_slice %arg5[%31, %c0_i32_17] : memref<128x32xf32, #tpu.memory_space<any>> -> memref<1x32xf32, #tpu.memory_space<any>>
    %c4_i32_18 = arith.constant 4 : i32
    %c0_i32_19 = arith.constant 0 : i32
    %33 = tpu.memref_slice %arg12[%c4_i32_18, %c0_i32_19] : memref<8x32xf32, #tpu.memory_space<vmem>> -> memref<1x32xf32, #tpu.memory_space<vmem>>
    %34 = tpu.memref_slice %arg13[%c4_i32_16] : memref<8x!tpu.dma_semaphore, #tpu.memory_space<semaphore_mem>> -> memref<1x!tpu.dma_semaphore, #tpu.memory_space<semaphore_mem>>
    %35 = tpu.memref_squeeze %34 : memref<1x!tpu.dma_semaphore, #tpu.memory_space<semaphore_mem>> -> memref<!tpu.dma_semaphore, #tpu.memory_space<semaphore_mem>>
    tpu.enqueue_dma source(%32 : memref<1x32xf32, #tpu.memory_space<any>>) target(%33 : memref<1x32xf32, #tpu.memory_space<vmem>>) target_semaphore(%35 : memref<!tpu.dma_semaphore, #tpu.memory_space<semaphore_mem>>)
    %c5_i32 = arith.constant 5 : i32
    %36 = arith.addi %0, %c5_i32 : i32
    %37 = arith.index_cast %36 : i32 to index
    %38 = memref.load %arg1[%37] : memref<16xi32, #tpu.memory_space<smem>>
    %c5_i32_20 = arith.constant 5 : i32
    %c0_i32_21 = arith.constant 0 : i32
    %39 = tpu.memref_slice %arg5[%38, %c0_i32_21] : memref<128x32xf32, #tpu.memory_space<any>> -> memref<1x32xf32, #tpu.memory_space<any>>
    %c5_i32_22 = arith.constant 5 : i32
    %c0_i32_23 = arith.constant 0 : i32
    %40 = tpu.memref_slice %arg12[%c5_i32_22, %c0_i32_23] : memref<8x32xf32, #tpu.memory_space<vmem>> -> memref<1x32xf32, #tpu.memory_space<vmem>>
    %41 = tpu.memref_slice %arg13[%c5_i32_20] : memref<8x!tpu.dma_semaphore, #tpu.memory_space<semaphore_mem>> -> memref<1x!tpu.dma_semaphore, #tpu.memory_space<semaphore_mem>>
    %42 = tpu.memref_squeeze %41 : memref<1x!tpu.dma_semaphore, #tpu.memory_space<semaphore_mem>> -> memref<!tpu.dma_semaphore, #tpu.memory_space<semaphore_mem>>
    tpu.enqueue_dma source(%39 : memref<1x32xf32, #tpu.memory_space<any>>) target(%40 : memref<1x32xf32, #tpu.memory_space<vmem>>) target_semaphore(%42 : memref<!tpu.dma_semaphore, #tpu.memory_space<semaphore_mem>>)
    %c6_i32 = arith.constant 6 : i32
    %43 = arith.addi %0, %c6_i32 : i32
    %44 = arith.index_cast %43 : i32 to index
    %45 = memref.load %arg1[%44] : memref<16xi32, #tpu.memory_space<smem>>
    %c6_i32_24 = arith.constant 6 : i32
    %c0_i32_25 = arith.constant 0 : i32
    %46 = tpu.memref_slice %arg5[%45, %c0_i32_25] : memref<128x32xf32, #tpu.memory_space<any>> -> memref<1x32xf32, #tpu.memory_space<any>>
    %c6_i32_26 = arith.constant 6 : i32
    %c0_i32_27 = arith.constant 0 : i32
    %47 = tpu.memref_slice %arg12[%c6_i32_26, %c0_i32_27] : memref<8x32xf32, #tpu.memory_space<vmem>> -> memref<1x32xf32, #tpu.memory_space<vmem>>
    %48 = tpu.memref_slice %arg13[%c6_i32_24] : memref<8x!tpu.dma_semaphore, #tpu.memory_space<semaphore_mem>> -> memref<1x!tpu.dma_semaphore, #tpu.memory_space<semaphore_mem>>
    %49 = tpu.memref_squeeze %48 : memref<1x!tpu.dma_semaphore, #tpu.memory_space<semaphore_mem>> -> memref<!tpu.dma_semaphore, #tpu.memory_space<semaphore_mem>>
    tpu.enqueue_dma source(%46 : memref<1x32xf32, #tpu.memory_space<any>>) target(%47 : memref<1x32xf32, #tpu.memory_space<vmem>>) target_semaphore(%49 : memref<!tpu.dma_semaphore, #tpu.memory_space<semaphore_mem>>)
    %c7_i32 = arith.constant 7 : i32
    %50 = arith.addi %0, %c7_i32 : i32
    %51 = arith.index_cast %50 : i32 to index
    %52 = memref.load %arg1[%51] : memref<16xi32, #tpu.memory_space<smem>>
    %c7_i32_28 = arith.constant 7 : i32
    %c0_i32_29 = arith.constant 0 : i32
    %53 = tpu.memref_slice %arg5[%52, %c0_i32_29] : memref<128x32xf32, #tpu.memory_space<any>> -> memref<1x32xf32, #tpu.memory_space<any>>
    %c7_i32_30 = arith.constant 7 : i32
    %c0_i32_31 = arith.constant 0 : i32
    %54 = tpu.memref_slice %arg12[%c7_i32_30, %c0_i32_31] : memref<8x32xf32, #tpu.memory_space<vmem>> -> memref<1x32xf32, #tpu.memory_space<vmem>>
    %55 = tpu.memref_slice %arg13[%c7_i32_28] : memref<8x!tpu.dma_semaphore, #tpu.memory_space<semaphore_mem>> -> memref<1x!tpu.dma_semaphore, #tpu.memory_space<semaphore_mem>>
    %56 = tpu.memref_squeeze %55 : memref<1x!tpu.dma_semaphore, #tpu.memory_space<semaphore_mem>> -> memref<!tpu.dma_semaphore, #tpu.memory_space<semaphore_mem>>
    tpu.enqueue_dma source(%53 : memref<1x32xf32, #tpu.memory_space<any>>) target(%54 : memref<1x32xf32, #tpu.memory_space<vmem>>) target_semaphore(%56 : memref<!tpu.dma_semaphore, #tpu.memory_space<semaphore_mem>>)
    %c0_i32_32 = arith.constant 0 : i32
    %c8_i32_33 = arith.constant 8 : i32
    %57 = arith.addi %c0_i32_32, %c8_i32_33 : i32
    %c1_i32_34 = arith.constant 1 : i32
    scf.for %arg14 = %c0_i32_32 to %57 step %c1_i32_34  : i32 {
      %c1_i32_49 = arith.constant 1 : i32
      %84 = arith.muli %arg14, %c1_i32_49 : i32
      %c0_i32_50 = arith.constant 0 : i32
      %85 = arith.addi %c0_i32_50, %84 : i32
      %c8_i32_51 = arith.constant 8 : i32
      %c0_i32_52 = arith.constant 0 : i32
      %86 = arith.cmpi eq, %c8_i32_51, %c0_i32_52 : i32
      %c1_i32_53 = arith.constant 1 : i32
      %87 = arith.select %86, %c1_i32_53, %c8_i32_51 : i32
      %88 = arith.remsi %85, %87 : i32
      %c0_i32_54 = arith.constant 0 : i32
      %89 = arith.cmpi ne, %88, %c0_i32_54 : i32
      %c0_i32_55 = arith.constant 0 : i32
      %90 = arith.cmpi slt, %88, %c0_i32_55 : i32
      %c0_i32_56 = arith.constant 0 : i32
      %91 = arith.cmpi slt, %87, %c0_i32_56 : i32
      %92 = arith.xori %90, %91 : i1
      %93 = arith.andi %92, %89 : i1
      %94 = arith.addi %88, %87 : i32
      %95 = arith.select %93, %94, %88 : i32
      %c0_i32_57 = arith.constant 0 : i32
      %c0_i32_58 = arith.constant 0 : i32
      %96 = tpu.memref_slice %arg5[%c0_i32_57, %c0_i32_58] : memref<128x32xf32, #tpu.memory_space<any>> -> memref<1x32xf32, #tpu.memory_space<any>>
      %c0_i32_59 = arith.constant 0 : i32
      %c0_i32_60 = arith.constant 0 : i32
      %97 = tpu.memref_slice %arg12[%c0_i32_59, %c0_i32_60] : memref<8x32xf32, #tpu.memory_space<vmem>> -> memref<1x32xf32, #tpu.memory_space<vmem>>
      %98 = tpu.memref_slice %arg13[%95] : memref<8x!tpu.dma_semaphore, #tpu.memory_space<semaphore_mem>> -> memref<1x!tpu.dma_semaphore, #tpu.memory_space<semaphore_mem>>
      %99 = tpu.memref_squeeze %98 : memref<1x!tpu.dma_semaphore, #tpu.memory_space<semaphore_mem>> -> memref<!tpu.dma_semaphore, #tpu.memory_space<semaphore_mem>>
      tpu.wait_dma2 semaphore(%99 : memref<!tpu.dma_semaphore, #tpu.memory_space<semaphore_mem>>) src(%96 : memref<1x32xf32, #tpu.memory_space<any>>) dst(%97 : memref<1x32xf32, #tpu.memory_space<vmem>>)
      %c8_i32_61 = arith.constant 8 : i32
      %100 = arith.addi %85, %c8_i32_61 : i32
      %c8_i32_62 = arith.constant 8 : i32
      %101 = arith.cmpi slt, %100, %c8_i32_62 : i32
      %102 = arith.extui %101 : i1 to i32
      %c0_i32_63 = arith.constant 0 : i32
      %103 = arith.cmpi ne, %102, %c0_i32_63 : i32
      scf.if %103 {
        %c8_i32_68 = arith.constant 8 : i32
        %121 = arith.addi %85, %c8_i32_68 : i32
        %122 = arith.addi %0, %121 : i32
        %123 = arith.index_cast %122 : i32 to index
        %124 = memref.load %arg1[%123] : memref<16xi32, #tpu.memory_space<smem>>
        %c0_i32_69 = arith.constant 0 : i32
        %125 = tpu.memref_slice %arg5[%124, %c0_i32_69] : memref<128x32xf32, #tpu.memory_space<any>> -> memref<1x32xf32, #tpu.memory_space<any>>
        %c0_i32_70 = arith.constant 0 : i32
        %126 = tpu.memref_slice %arg12[%121, %c0_i32_70] : memref<8x32xf32, #tpu.memory_space<vmem>> -> memref<1x32xf32, #tpu.memory_space<vmem>>
        %127 = tpu.memref_slice %arg13[%95] : memref<8x!tpu.dma_semaphore, #tpu.memory_space<semaphore_mem>> -> memref<1x!tpu.dma_semaphore, #tpu.memory_space<semaphore_mem>>
        %128 = tpu.memref_squeeze %127 : memref<1x!tpu.dma_semaphore, #tpu.memory_space<semaphore_mem>> -> memref<!tpu.dma_semaphore, #tpu.memory_space<semaphore_mem>>
        tpu.enqueue_dma source(%125 : memref<1x32xf32, #tpu.memory_space<any>>) target(%126 : memref<1x32xf32, #tpu.memory_space<vmem>>) target_semaphore(%128 : memref<!tpu.dma_semaphore, #tpu.memory_space<semaphore_mem>>)
      } else {
      }
      %104 = arith.addi %0, %85 : i32
      %105 = arith.index_cast %104 : i32 to index
      %106 = memref.load %arg2[%105] : memref<16xi32, #tpu.memory_space<smem>>
      %107 = arith.index_cast %106 : i32 to index
      %c0_64 = arith.constant 0 : index
      %108 = vector.load %arg6[%107, %c0_64] : memref<2x32xf32, #tpu.memory_space<vmem>>, vector<1x32xf32>
      %109 = arith.index_cast %104 : i32 to index
      %110 = memref.load %arg3[%109] : memref<16xi32, #tpu.memory_space<smem>>
      %111 = arith.index_cast %110 : i32 to index
      %c0_65 = arith.constant 0 : index
      %112 = vector.load %arg7[%111, %c0_65] : memref<64x32xf32, #tpu.memory_space<vmem>>, vector<1x32xf32>
      %113 = arith.addf %108, %112 : vector<1x32xf32>
      %114 = arith.index_cast %104 : i32 to index
      %115 = memref.load %arg4[%114] : memref<16xi32, #tpu.memory_space<smem>>
      %116 = arith.index_cast %115 : i32 to index
      %c0_66 = arith.constant 0 : index
      %117 = vector.load %arg8[%116, %c0_66] : memref<48x32xf32, #tpu.memory_space<vmem>>, vector<1x32xf32>
      %118 = arith.addf %113, %117 : vector<1x32xf32>
      %119 = arith.index_cast %85 : i32 to index
      %c0_67 = arith.constant 0 : index
      %120 = vector.load %arg11[%119, %c0_67] : memref<8x32xf32, #tpu.memory_space<vmem>>, vector<1x32xf32>
      tpu.vector_store %arg11[%119, %c0_67], %118 {strides = array<i32>} : memref<8x32xf32, #tpu.memory_space<vmem>>, vector<1x32xf32>,
    }
    %c8_i32_35 = arith.constant 8 : i32
    %c0 = arith.constant 0 : index
    %c0_36 = arith.constant 0 : index
    %58 = vector.load %arg11[%c0, %c0_36] : memref<8x32xf32, #tpu.memory_space<vmem>>, vector<8x32xf32>
    %c0_37 = arith.constant 0 : index
    %c0_38 = arith.constant 0 : index
    %59 = vector.load %arg12[%c0_37, %c0_38] : memref<8x32xf32, #tpu.memory_space<vmem>>, vector<8x32xf32>
    %60 = arith.addf %58, %59 : vector<8x32xf32>
    %cst = arith.constant dense<0.000000e+00> : vector<8xf32>
    %61 = vector.multi_reduction <add>, %60, %cst [1] : vector<8x32xf32> to vector<8xf32>
    %62 = vector.shape_cast %61 : vector<8xf32> to vector<8x1xf32>
    %cst_39 = arith.constant 3.200000e+01 : f32
    %63 = vector.broadcast %cst_39 : f32 to vector<8x1xf32>
    %64 = arith.divf %62, %63 : vector<8x1xf32>
    %65 = vector.broadcast %64 : vector<8x1xf32> to vector<8x32xf32>
    %66 = arith.subf %60, %65 : vector<8x32xf32>
    %67 = arith.mulf %66, %66 : vector<8x32xf32>
    %cst_40 = arith.constant dense<0.000000e+00> : vector<8xf32>
    %68 = vector.multi_reduction <add>, %67, %cst_40 [1] : vector<8x32xf32> to vector<8xf32>
    %69 = vector.shape_cast %68 : vector<8xf32> to vector<8x1xf32>
    %cst_41 = arith.constant 3.200000e+01 : f32
    %70 = vector.broadcast %cst_41 : f32 to vector<8x1xf32>
    %71 = arith.divf %69, %70 : vector<8x1xf32>
    %cst_42 = arith.constant 9.99999996E-13 : f32
    %72 = vector.broadcast %cst_42 : f32 to vector<8x1xf32>
    %73 = arith.addf %71, %72 : vector<8x1xf32>
    %74 = math.rsqrt %73 : vector<8x1xf32>
    %75 = vector.broadcast %74 : vector<8x1xf32> to vector<8x32xf32>
    %76 = arith.mulf %66, %75 : vector<8x32xf32>
    %c0_43 = arith.constant 0 : index
    %c0_44 = arith.constant 0 : index
    %77 = vector.load %arg9[%c0_43, %c0_44] : memref<1x32xf32, #tpu.memory_space<vmem>>, vector<1x32xf32>
    %78 = vector.broadcast %77 : vector<1x32xf32> to vector<8x32xf32>
    %79 = arith.mulf %76, %78 : vector<8x32xf32>
    %c0_45 = arith.constant 0 : index
    %c0_46 = arith.constant 0 : index
    %80 = vector.load %arg10[%c0_45, %c0_46] : memref<1x32xf32, #tpu.memory_space<vmem>>, vector<1x32xf32>
    %81 = vector.broadcast %80 : vector<1x32xf32> to vector<8x32xf32>
    %82 = arith.addf %79, %81 : vector<8x32xf32>
    %c0_47 = arith.constant 0 : index
    %c0_48 = arith.constant 0 : index
    %83 = vector.load %arg11[%c0_47, %c0_48] : memref<8x32xf32, #tpu.memory_space<vmem>>, vector<8x32xf32>
    tpu.vector_store %arg11[%c0_47, %c0_48], %82 {strides = array<i32>} : memref<8x32xf32, #tpu.memory_space<vmem>>, vector<8x32xf32>,
    return
  }
  func.func @transform_1(%arg0: i32, %arg1: memref<16xi32, #tpu.memory_space<smem>>, %arg2: memref<16xi32, #tpu.memory_space<smem>>, %arg3: memref<16xi32, #tpu.memory_space<smem>>, %arg4: memref<16xi32, #tpu.memory_space<smem>>) -> (i32, i32) {
    %c0_i32 = arith.constant 0 : i32
    %c0_i32_0 = arith.constant 0 : i32
    %c0_i32_1 = arith.constant 0 : i32
    return %c0_i32, %c0_i32_0 : i32, i32
  }
  func.func @transform_2(%arg0: i32, %arg1: memref<16xi32, #tpu.memory_space<smem>>, %arg2: memref<16xi32, #tpu.memory_space<smem>>, %arg3: memref<16xi32, #tpu.memory_space<smem>>, %arg4: memref<16xi32, #tpu.memory_space<smem>>) -> (i32, i32) {
    %c0_i32 = arith.constant 0 : i32
    %c0_i32_0 = arith.constant 0 : i32
    %c0_i32_1 = arith.constant 0 : i32
    return %c0_i32, %c0_i32_0 : i32, i32
  }
  func.func @transform_3(%arg0: i32, %arg1: memref<16xi32, #tpu.memory_space<smem>>, %arg2: memref<16xi32, #tpu.memory_space<smem>>, %arg3: memref<16xi32, #tpu.memory_space<smem>>, %arg4: memref<16xi32, #tpu.memory_space<smem>>) -> (i32, i32) {
    %c0_i32 = arith.constant 0 : i32
    %c0_i32_0 = arith.constant 0 : i32
    %c0_i32_1 = arith.constant 0 : i32
    return %c0_i32, %c0_i32_0 : i32, i32
  }
  func.func @transform_4(%arg0: i32, %arg1: memref<16xi32, #tpu.memory_space<smem>>, %arg2: memref<16xi32, #tpu.memory_space<smem>>, %arg3: memref<16xi32, #tpu.memory_space<smem>>, %arg4: memref<16xi32, #tpu.memory_space<smem>>) -> (i32, i32) {
    %c0_i32 = arith.constant 0 : i32
    %c0_i32_0 = arith.constant 0 : i32
    %c0_i32_1 = arith.constant 0 : i32
    return %c0_i32, %c0_i32_0 : i32, i32
  }
  func.func @transform_5(%arg0: i32, %arg1: memref<16xi32, #tpu.memory_space<smem>>, %arg2: memref<16xi32, #tpu.memory_space<smem>>, %arg3: memref<16xi32, #tpu.memory_space<smem>>, %arg4: memref<16xi32, #tpu.memory_space<smem>>) -> (i32, i32) {
    %c0_i32 = arith.constant 0 : i32
    %c0_i32_0 = arith.constant 0 : i32
    %c0_i32_1 = arith.constant 0 : i32
    return %c0_i32, %c0_i32_0 : i32, i32
  }
  func.func @transform_6(%arg0: i32, %arg1: memref<16xi32, #tpu.memory_space<smem>>, %arg2: memref<16xi32, #tpu.memory_space<smem>>, %arg3: memref<16xi32, #tpu.memory_space<smem>>, %arg4: memref<16xi32, #tpu.memory_space<smem>>) -> (i32, i32) {
    %c0_i32 = arith.constant 0 : i32
    %c0_i32_0 = arith.constant 0 : i32
    return %arg0, %c0_i32 : i32, i32
  }
}

</mosaic_0001>

<bundles_post_ra>
// kernel: tpu_custom_call.1
= control target key start
LH: loop header
LB: loop body
LE: loop exit
PB: predicated region body
PF: predicated region fallthrough
CT: control target
= control target key end

     0   :  { %s1044_s19 = smov [#allocation5]   ;;  %s1045_s20 = smov [#allocation6]   ;;  %s1275_s0 = inlined_call_operand.vmem [shape: s32[16], index: 0, kind: input, shape index: {}]   ;;  %s1276_s4 = inlined_call_operand.vmem [shape: f32[128,32], index: 4, kind: input, shape index: {}]   ;;  %s1277_s5 = inlined_call_operand.vmem [shape: f32[2,32], index: 5, kind: input, shape index: {}]   ;;  %s1278_s6 = inlined_call_operand.vmem [shape: f32[64,32], index: 6, kind: input, shape index: {}]   ;;  %s1279_s7 = inlined_call_operand.vmem [shape: f32[48,32], index: 7, kind: input, shape index: {}]   ;;  %s1280_s8 = inlined_call_operand.vmem [shape: f32[1,32], index: 8, kind: input, shape index: {}]   ;;  %s1281_s9 = inlined_call_operand.vmem [shape: f32[1,32], index: 9, kind: input, shape index: {}]   ;;  %s1282_s10 = inlined_call_operand.hbm [shape: f32[16,32], index: 10, kind: output, shape index: {}]   ;;  %s1283_s1 = inlined_call_operand.vmem [shape: s32[16], index: 1, kind: input, shape index: {}]   ;;  %s1284_s2 = inlined_call_operand.vmem [shape: s32[16], index: 2, kind: input, shape index: {}]   ;;  %s1285_s3 = inlined_call_operand.vmem [shape: s32[16], index: 3, kind: input, shape index: {}]  }
   0x1   :  { %1287 = sst [smem:[#allocation23_spill]] %s1276_s4  ;;  %s16_s15 = sshll.u32 %s1275_s0, 4  ;;  %s17_s15 = int_to_ptr.vmem [resolvable:$true] %s16_s15 }
   0x2   :  { %s21_s18 = sshll.u32 %s1283_s1, 4  ;;  %s26_s23 = sshll.u32 %s1284_s2, 4  ;;  %s22_s18 = int_to_ptr.vmem [resolvable:$true] %s21_s18  ;;  %s27_s23 = int_to_ptr.vmem [resolvable:$true] %s26_s23 }
   0x3   :  { %19 = dma.vmem_to_smem %s17_s15, 16, %s1044_s19, [#allocation4] }
   0x4   :  { %24 = dma.vmem_to_smem %s22_s18, 16, %s1045_s20, [#allocation4] }
   0x5   :  { %s31_s26 = sshll.u32 %s1285_s3, 4  ;;  %s1046_s0 = smov [#allocation7]   ;;  %s32_s26 = int_to_ptr.vmem [resolvable:$true] %s31_s26 }
   0x6   :  { %29 = dma.vmem_to_smem %s27_s23, 16, %s1046_s0, [#allocation4] }
   0x7   :  { %s1047_s27 = smov [#allocation8]  }
   0x8   :  { %34 = dma.vmem_to_smem %s32_s26, 16, %s1047_s27, [#allocation4] }
   0x9   :  { %1016 = dma.done.wait [#allocation4], 64 }
   0xa   :  { %1017 = vsyncadd [#allocation4], 4294967232 }
   0xb   :  { %37 = sfence }
   0xc   :  { %38 = vsyncpa [#allocation10], 0 }
   0xd   :  { %40 = vsyncpa [#allocation10 + $0x1], 0  ;;  %s1116_s1 = smov 0   ;;  %s1118_s28 = smov 0  }
   0xe   :  { %s1120_s2 = smov 0   ;;  %s1122_s29 = smov 0  }
   0xf LB: > { %s839_s3 = sadd.s32 4294967295, %s1038_s29   ;;  %s840_s30 = sadd.s32 4294967294, %s1038_s29   ;;  %s1038_s29 = sphi %s1122_s29, %s1296_s29   ;;  %s1034_s2 = sphi %s1120_s2, %s1295_s2   ;;  %s1030_s28 = sphi %s1118_s28, %s1294_s28   ;;  %s1026_s1 = sphi %s1116_s1, %s1293_s1  }
  0x10   : > { %s1139_s11 = sadd.s32 1, %s1038_s29   ;;  %s158_s12 = sadd.s32 1, %s1034_s2 }
  0x11   : > { %s155_s13 = ssub.s32 %s1038_s29, %s1139_s11  ;;  %p168_p0 = scmp.ne.s32.totalorder %s1034_s2, %s1030_s28 }
  0x12   : > { %p156_p1 = scmp.eq.s32.totalorder %s155_s13, 0  ;;  %p169_p2 = scmp.eq.s32.totalorder %s839_s3, 1 }
  0x13   : > { %p174_p3 = scmp.ne.s32.totalorder %s1030_s28, %s1026_s1  ;;  %p175_p4 = scmp.eq.s32.totalorder %s840_s30, 1 }
  0x14   : > { %s1149_s14 = scalar_select %p156_p1, %s1034_s2, %s158_s12  }
  0x15   : > { %p1151_p5 = por %p169_p2, %p168_p0  ;;  %p1155_p6 = por %p175_p4, %p174_p3 }
  0x16   : > { %p842_p7 = scmp.ge.s32.totalorder %s1038_s29, 1  ;;  %p208_p8 = scmp.lt.s32.totalorder %s1038_s29, 3 }
  0x18   : > { %p209_p9 = pnand %p842_p7, %p208_p8 }
  0x19   : > { %s1286_s17 = sand.u32 (!%p209_p9), 1, %s1030_s28   ;;  %s1162_s18 = sshll.u32 (!%p209_p9), %s839_s3, 3 }
  0x1a   : > { %212 = sbr.rel (%p209_p9) target bundleno = 426 (0x1aa), region = 40  ;;  %s843_s19 = sshll.u32 (!%p209_p9), %s1286_s17, 3 }
  0x1b   : > { %s232_s20 = sld [smem:[#allocation5 + %s1162_s18]] (!%p209_p9)  ;;  %s1170_s24 = scalar_lea.vmem (!%p209_p9), [#allocation9], %s843_s19 }
  0x1c   : > { %s1290_s4 = sld [smem:[#allocation23_spill]] (!%p209_p9) }
  0x22   : > { %s233_s23 = scalar_lea.vmem %s1290_s4, %s232_s20 }
  0x23   : > { %v248_v0 = vld [vmem:[%s233_s23] sm:$0x1] }
  0x24   : > { %249 = vst [vmem:[#allocation2] sm:$0x1] %v248_v0 }
  0x25   : > { %267 = vsyncadd [#allocation3], 16  ;;  %s268_s25 = sadd.s32 1, %s1162_s18 }
  0x26   : > { %s269_s26 = sld [smem:[#allocation5 + %s268_s25]] }
  0x2c   : > { %s270_s3 = scalar_lea.vmem %s1290_s4, %s269_s26 }
  0x2d   : > { %v287_v1 = vld [vmem:[%s270_s3] sm:$0x1] }
  0x2e   : > { %288 = vst [vmem:[#allocation2 + $0x1] sm:$0x1] %v287_v1 }
  0x2f   : > { %306 = vsyncadd [#allocation3 + $0x1], 16  ;;  %s307_s30 = sadd.s32 2, %s1162_s18 }
  0x30   : > { %s308_s12 = sld [smem:[#allocation5 + %s307_s30]] }
  0x36   : > { %s309_s21 = scalar_lea.vmem %s1290_s4, %s308_s12 }
  0x37   : > { %v326_v2 = vld [vmem:[%s309_s21] sm:$0x1] }
  0x38   : > { %327 = vst [vmem:[#allocation2 + $0x2] sm:$0x1] %v326_v2 }
  0x39   : > { %345 = vsyncadd [#allocation3 + $0x2], 16  ;;  %s346_s19 = sadd.s32 3, %s1162_s18 }
  0x3a   : > { %s347_s22 = sld [smem:[#allocation5 + %s346_s19]] }
  0x40   : > { %s348_s26 = scalar_lea.vmem %s1290_s4, %s347_s22 }
  0x41   : > { %v365_v3 = vld [vmem:[%s348_s26] sm:$0x1] }
  0x42   : > { %366 = vst [vmem:[#allocation2 + $0x3] sm:$0x1] %v365_v3 }
  0x43   : > { %384 = vsyncadd [#allocation3 + $0x3], 16  ;;  %s385_s0 = sadd.s32 4, %s1162_s18 }
  0x44   : > { %s386_s27 = sld [smem:[#allocation5 + %s385_s0]] }
  0x4a   : > { %s387_s12 = scalar_lea.vmem %s1290_s4, %s386_s27 }
  0x4b   : > { %v404_v4 = vld [vmem:[%s387_s12] sm:$0x1] }
  0x4c   : > { %405 = vst [vmem:[#allocation2 + $0x4] sm:$0x1] %v404_v4 }
  0x4d   : > { %423 = vsyncadd [#allocation3 + $0x4], 16  ;;  %s424_s13 = sadd.s32 5, %s1162_s18 }
  0x4e   : > { %s425_s20 = sld [smem:[#allocation5 + %s424_s13]] }
  0x54   : > { %s426_s22 = scalar_lea.vmem %s1290_s4, %s425_s20 }
  0x55   : > { %v443_v5 = vld [vmem:[%s426_s22] sm:$0x1] }
  0x56   : > { %444 = vst [vmem:[#allocation2 + $0x5] sm:$0x1] %v443_v5 }
  0x57   : > { %462 = vsyncadd [#allocation3 + $0x5], 16  ;;  %s463_s23 = sadd.s32 6, %s1162_s18 }
  0x58   : > { %s464_s25 = sld [smem:[#allocation5 + %s463_s23]] }
  0x5e   : > { %s465_s27 = scalar_lea.vmem %s1290_s4, %s464_s25 }
  0x5f   : > { %v482_v6 = vld [vmem:[%s465_s27] sm:$0x1] }
  0x60   : > { %483 = vst [vmem:[#allocation2 + $0x6] sm:$0x1] %v482_v6 }
  0x61   : > { %501 = vsyncadd [#allocation3 + $0x6], 16  ;;  %s502_s3 = sadd.s32 7, %s1162_s18 }
  0x62   : > { %s503_s30 = sld [smem:[#allocation5 + %s502_s3]] }
  0x68   : > { %s504_s20 = scalar_lea.vmem %s1290_s4, %s503_s30 }
  0x69   : > { %v521_v7 = vld [vmem:[%s504_s20] sm:$0x1] }
  0x6a   : > { %522 = vst [vmem:[#allocation2 + $0x7] sm:$0x1] %v521_v7 }
  0x6b   : > { %540 = vsyncadd [#allocation3 + $0x7], 16  ;;  %s1200_s21 = smov 0  }
  0x6c LB: >> { %p547_p10 = scmp.lt.s32.totalorder %s1042_s21, 0  ;;  %s548_s19 = ssub.s32 0, %s1042_s21  ;;  %s1042_s21 = sphi %s1200_s21, %s546_s21  }
  0x6d   : >> { %s845_s22 = smin.u32 %s1042_s21, %s548_s19 }
  0x6e   : >> { %s550_s23 = sand.u32 7, %s845_s22  }
  0x6f   : >> { %s551_s25 = ssub.s32 0, %s550_s23 }
  0x70   : >> { %s1298_s25 = smov (!%p547_p10, %s551_s25), %s550_s23 }
  0x71   : >> { %p847_p11 = scmp.lt.s32.totalorder %s1298_s25, 0  ;;  %s557_s26 = sadd.s32 8, %s1298_s25 }
  0x73   : >> { %s1300_s26 = smov (!%p847_p11, %s557_s26), %s1298_s25 }
  0x74   : >> { %s559_s0 = scalar_lea.sflag [#allocation3], %s1300_s26 }
  0x75   : >> { %1018 = dma.done.wait %s559_s0, 16 }
  0x76   : >> { %1019 = vsyncadd %s559_s0, 4294967280  ;;  %s563_s27 = sadd.s32 8, %s1042_s21 }
  0x77   : >> { %p848_p12 = scmp.ge.s32.totalorder %s563_s27, 8 }
  0x78   : >> { %s568_s3 = sadd.s32 (!%p848_p12), %s1162_s18, %s563_s27  ;;  %s1291_s4 = sld [smem:[#allocation23_spill]] (!%p848_p12) }
  0x79   : >> { %567 = sbr.rel (%p848_p12) target bundleno = 131 (0x83), region = 291  ;;  %s569_s30 = sld [smem:[#allocation5 + %s568_s3]] (!%p848_p12) }
  0x7a   : >> { %s770_s19 = scalar_lea.vmem (!%p848_p12), [#allocation2], %s1042_s21 }
  0x7f   : >> { %s570_s20 = scalar_lea.vmem %s1291_s4, %s569_s30 }
  0x80   : >> { %v586_v8 = vld [vmem:[%s570_s20] sm:$0x1] }
  0x81   : >> { %849 = vst [vmem:[%s770_s19 + $0x8] sm:$0x1] %v586_v8 }
  0x82   : >> { %605 = vsyncadd %s559_s0, 16 }
  0x83 PF: >> { %s606_s22 = sadd.s32 %s1042_s21, %s1162_s18  ;;  %s618_s4 = scalar_lea.vmem %s1170_s24, %s1042_s21 [#allocation9]  ;;  %vm619_vm0 = vcmask 253952  }
  0x84   : >> { %s607_s23 = sld [smem:[#allocation6 + %s606_s22]]  ;;  %s546_s21 = sadd.s32 1, %s1042_s21  }
  0x85   : >> { %s610_s25 = sld [smem:[#allocation7 + %s606_s22]]  ;;  %p543_p13 = scmp.ge.s32.totalorder %s546_s21, 8  }
  0x86   : >> { %s614_s26 = sld [smem:[#allocation8 + %s606_s22]]  ;;  %vm624_vm1 = vcmask (%p543_p13), 261120   ;;  %v1048_v18 = vmov (%p543_p13), 32.0   ;;  %v914_v39 = vld [vmem:[%s1280_s8] ss:$0 sm:$0xff] (%p543_p13)  ;;  %s678_s27 = sshll.u32 (%p543_p13), %s1170_s24, 4  ;;  %s679_s27 = int_to_ptr.vmem [resolvable:$true] %s678_s27 }
  0x87   : > { %916 = vrcp.f32 (%p543_p13), %v1048_v18  ;;  %v915_v42 = vld [vmem:[%s1281_s9] ss:$0 sm:$0xff] (%p543_p13)  ;;  %s1292_s12 = sand.u32 (%p543_p13), 1, %s1030_s28  }
  0x88   : > { %v622_v15 = vld [vmem:[#allocation2] sm:$0xff] (%p543_p13)  ;;  %s666_s30 = scalar_lea.sflag (%p543_p13), [#allocation10], %s1292_s12 }
  0x8a   : >> { %s608_s3 = scalar_lea.vmem %s1277_s5, %s607_s23  ;;  %s676_s23 = scalar_lea.hbm (%p543_p13), %s1282_s10, %s1162_s18 }
  0x8b   : >> { %v609_v9 = vld [vmem:[%s608_s3] sm:$0x1]  ;;  %s611_s13 = scalar_lea.vmem %s1278_s6, %s610_s25  ;;  %s680_s3 = sshll.u32 (%p543_p13), %s676_s23, 4  ;;  %s681_s3 = int_to_ptr.hbm [resolvable:$true] %s680_s3 }
  0x8c   : >> { %v612_v10 = vld [vmem:[%s611_s13] sm:$0x1]  ;;  %s615_s19 = scalar_lea.vmem %s1279_s7, %s614_s26  ;;  %s982_s13 = sshra.s32 (%p543_p13), %s681_s3, 4  ;;  %s983_s13 = int_to_ptr.hbm [resolvable:$true] %s982_s13 }
  0x8d   : >> { %v613_v11 = vadd.f32 %v612_v10, %v609_v9  ;;  %v616_v12 = vld [vmem:[%s615_s19] sm:$0x1]  ;;  %545 = sbr.rel (!%p543_p13) target bundleno = 108 (0x6c), region = 425  ;;  %v917_v19 = vpop.eup (%p543_p13), %916  ;;  %s984_s18 = scalar_lea.hbm (%p543_p13), %s983_s13, 8 }
  0x8e   : > { %v629_v20 = vmul.f32 (%p543_p13), 32.0, %v917_v19  ;;  %vm633_vm2 = vweird.f32 (%p543_p13), %v917_v19  ;;  %p985_p0 = scmp.ne.s32.totalorder (%p543_p13), %s983_s13, %s984_s18  ;;  %s988_s19 = scalar_lea.hbm (%p543_p13), %s1282_s10, 16 }
  0x8f   : >> { %v617_v13 = vadd.f32 %v616_v12, %v613_v11  ;;  %p989_p3 = scmp.lt.s32.totalorder (%p543_p13), %s983_s13, %s1282_s10  ;;  %p990_p4 = scmp.lt.s32.totalorder (%p543_p13), %s988_s19, %s984_s18 }
  0x90   : > { %v630_v21 = vsub.f32 (%p543_p13), 1.0, %v629_v20  ;;  %p986_p1 = pnand (%p543_p13), %p985_p0, %p1151_p5 }
  0x91   : >> { %620 = vst.msk [vmem:[%s618_s4] sm:$0x1] %vm619_vm0, %v617_v13  ;;  %p991_p7 = por (%p543_p13), %p990_p4, %p989_p3 }
  0x92   : > { %v631_v22 = vmul.f32 %v917_v19, %v630_v21  ;;  %p987_p2 = pneg %p986_p1 }
  0x94   : > { %v632_v23 = vadd.f32 %v917_v19, %v631_v22  ;;  %p992_p8 = pnand %p991_p7, %p987_p2 }
  0x96   : > { %v634_v24 = vsel %vm633_vm2, %v917_v19, %v632_v23 }
  0x98   : > { %v621_v14 = vld [vmem:[%s1170_s24] sm:$0xff] }
  0x99   : > { %v623_v16 = vadd.f32 %v622_v15, %v621_v14 }
  0x9b   : > { %v625_v17 = vsel %vm624_vm1, %v623_v16, 0.0 }
  0x9c   : > { %626 = vadd.xlane.f32.xlu0 %v625_v17 }
 0x10f   : > { %v627_v25 = vpop.xlane.xlu0 %626 }
 0x110   : > { %v635_v26 = vmul.f32 %v634_v24, %v627_v25 }
 0x112   : > { %v636_v27 = vsub.f32 %v623_v16, %v635_v26 }
 0x114   : > { %v637_v28 = vmul.f32 %v636_v27, %v636_v27 }
 0x116   : > { %v638_v29 = vsel %vm624_vm1, %v637_v28, 0.0 }
 0x117   : > { %639 = vadd.xlane.f32.xlu0 %v638_v29 }
 0x18a   : > { %v640_v30 = vpop.xlane.xlu0 %639 }
 0x18b   : > { %v641_v31 = vmul.f32 %v640_v30, %v634_v24 }
 0x18d   : > { %v642_v32 = vadd.f32 1e-12, %v641_v31 }
 0x18f   : > { %918 = vrsqrt.f32 %v642_v32  ;;  %vm649_vm4 = vweird.f32 %v642_v32 }
 0x195   : > { %v919_v33 = vpop.eup %918 }
 0x196   : > { %v644_v34 = vmul.f32 %v919_v33, %v642_v32  ;;  %vm650_vm3 = vweird.f32 %v919_v33 }
 0x197   : > { %vm651_vm5 = vmor %vm649_vm4, %vm650_vm3 }
 0x198   : > { %v645_v35 = vmul.f32 %v919_v33, %v644_v34 }
 0x19a   : > { %v646_v36 = vmul.f32 0.5, %v645_v35 }
 0x19c   : > { %v647_v37 = vsub.f32 1.5, %v646_v36 }
 0x19e   : > { %v648_v38 = vmul.f32 %v919_v33, %v647_v37 }
 0x1a0   : > { %v652_v40 = vsel %vm651_vm5, %v919_v33, %v648_v38 }
 0x1a1   : > { %v653_v41 = vmul.f32 %v652_v40, %v636_v27 }
 0x1a3   : > { %v658_v43 = vmul.f32 %v914_v39, %v653_v41 }
 0x1a5   : > { %v663_v44 = vadd.f32 %v915_v42, %v658_v43 }
 0x1a7   : > { %664 = vst.msk [vmem:[%s1170_s24] sm:$0xff] %vm624_vm1, %v663_v44 }
 0x1a8   : > { %995 = shalt.err (!%p992_p8)
}
 0x1a9   : > { %862 = dma.vmem_to_hbm [thread:$0]  (%p1151_p5), %s679_s27, 128, %s681_s3, %s666_s30  }
 0x1aa PF: > { %p868_p9 = scmp.ge.s32.totalorder %s1038_s29, 2  ;;  %s692_s24 = sand.u32 1, %s1026_s1  }
 0x1ab   : > { %s693_s21 = scalar_lea.sflag [#allocation10], %s692_s24 }
 0x1ac   : > { %p865_p10 = pnand %p868_p9, %p1155_p6 }
 0x1ae   : > { %p866_p11 = pneg %p865_p10 }
 0x1b0   : > { %1021 = dma.done.wait (%p866_p11), %s693_s21, 128  }
 0x1b1   : > { %1023 = vsyncadd (%p866_p11), %s693_s21, 4294967168  ;;  %p43_p12 = scmp.ge.s32.totalorder %s1139_s11, 4   ;;  %s1293_s1 = smov %s1030_s28 }
 0x1b2   : > { %s1294_s28 = smov %s1034_s2  ;;  %s1295_s2 = smov %s1149_s14 }
 0x1b3   : > { %s1296_s29 = smov %s1139_s11  ;;  %45 = sbr.rel (!%p43_p12) target bundleno = 15 (0xf), region = 436 }
 0x1b8   :  { %699 = vsyncpa [#allocation10], 1 }
 0x1b9   :  { %701 = vsyncpa [#allocation10 + $0x1], 1 }
 0x1ba   :  { %702 = vsyncmov [#allocation3] }
 0x1bd   :  { %s703_s29 = vpop.sfrf %702 }
 0x1be   :  { %p854_p5 = scmp.ne.s32.totalorder %s703_s29, 0 }
 0x1c0   :  { %707 = shalt.err (%p854_p5)  }
 0x1c1   :  { %709 = vsyncmov [#allocation3 + $0x1] }
 0x1c4   :  { %s710_s15 = vpop.sfrf %709 }
 0x1c5   :  { %p855_p6 = scmp.ne.s32.totalorder %s710_s15, 0 }
 0x1c7   :  { %714 = shalt.err (%p855_p6)  }
 0x1c8   :  { %716 = vsyncmov [#allocation3 + $0x2] }
 0x1cb   :  { %s717_s16 = vpop.sfrf %716 }
 0x1cc   :  { %p856_p13 = scmp.ne.s32.totalorder %s717_s16, 0 }
 0x1ce   :  { %721 = shalt.err (%p856_p13)  }
 0x1cf   :  { %723 = vsyncmov [#allocation3 + $0x3] }
 0x1d2   :  { %s724_s22 = vpop.sfrf %723 }
 0x1d3   :  { %p857_p0 = scmp.ne.s32.totalorder %s724_s22, 0 }
 0x1d5   :  { %728 = shalt.err (%p857_p0)  }
 0x1d6   :  { %730 = vsyncmov [#allocation3 + $0x4] }
 0x1d9   :  { %s731_s11 = vpop.sfrf %730 }
 0x1da   :  { %p858_p1 = scmp.ne.s32.totalorder %s731_s11, 0 }
 0x1dc   :  { %735 = shalt.err (%p858_p1)  }
 0x1dd   :  { %737 = vsyncmov [#allocation3 + $0x5] }
 0x1e0   :  { %s738_s5 = vpop.sfrf %737 }
 0x1e1   :  { %p859_p2 = scmp.ne.s32.totalorder %s738_s5, 0 }
 0x1e3   :  { %742 = shalt.err (%p859_p2)  }
 0x1e4   :  { %744 = vsyncmov [#allocation3 + $0x6] }
 0x1e7   :  { %s745_s6 = vpop.sfrf %744 }
 0x1e8   :  { %p860_p3 = scmp.ne.s32.totalorder %s745_s6, 0 }
 0x1ea   :  { %749 = shalt.err (%p860_p3)  }
 0x1eb   :  { %751 = vsyncmov [#allocation3 + $0x7] }
 0x1ee   :  { %s752_s7 = vpop.sfrf %751 }
 0x1ef   :  { %p861_p4 = scmp.ne.s32.totalorder %s752_s7, 0 }
 0x1f1   :  { %756 = shalt.err (%p861_p4)  }

</bundles_post_ra>
